<compile_context>
chip_gen: v7x
topology: tpu7x:2x2x1
jax: 0.10.0
libtpu: 0.0.40
codegen_flags: <defaults>
</compile_context>

<pallas_src>
import math

import jax
import jax.numpy as jnp
from jax.experimental import pallas as pl
from jax.experimental.pallas import tpu as pltpu


_NEG_SLOPE = 0.01                       # nn.LeakyReLU() default
_MASK_FILL = -9000000000000000.0        # module's zero_vec value


def _vmem_limit_bytes():
    """Generation-aware VMEM limit: ~40 MiB on v7x (64 MiB physical),
    ~96 MiB on v5e/v6e (128 MiB physical)."""
    cap = None
    try:
        cap = getattr(pltpu.get_tpu_info(), "vmem_capacity_bytes", None)
    except Exception:
        cap = None
    if cap is None:
        cap = 64 * 1024 * 1024          # conservative fallback (v7x floor)
    return 40 * 1024 * 1024 if cap <= 64 * 1024 * 1024 else 96 * 1024 * 1024


def _pick_row_tile(n, nhid, vmem_budget_bytes, max_tile=1024):
    """Largest row tile TQ <= max_tile that divides n, is a multiple of 8 and
    keeps kernel 2's full resident footprint within the budget:
    per query row ~ double-buffered bf16 (TQ,N) logits tile (4 B/col) + f32
    softmax intermediates (~8 B/col) + bf16 p (2 B/col) + f32 (TQ,H) out tile;
    fixed cost ~ double-buffered bf16 (N,H) h block."""
    if n % 8 != 0:
        # TODO(synk): pad N to a multiple of 8 + mask instead of one full block.
        return n
    per_row = 14 * n + 16 * nhid
    fixed = 4 * n * nhid
    cap = max(8, (vmem_budget_bytes - fixed) // per_row)
    cap = max(8, (cap // 8) * 8)
    t = (min(max_tile, n, cap) // 8) * 8
    while t >= 8:
        if n % t == 0:
            return t
        t -= 8
    return n


# ---------------------------------------------------------------------------
# Kernel 1: projection + per-node attention scores (row-tiled, fully parallel)
# ---------------------------------------------------------------------------
def gat_proj_kernel(x_ref, wt_ref, bw_ref, a1_ref, a2_ref,
                    h_ref, s1_ref, s2_ref):
    # bf16 x bf16 -> f32 accumulation on the MXU.
    hf = jnp.dot(x_ref[0], wt_ref[...], preferred_element_type=jnp.float32)
    hf = hf + bw_ref[...]                                   # (TQ, H) f32
    h_ref[0] = hf.astype(h_ref.dtype)                       # bf16 store
    # Per-node scores (VPU row reductions, no degenerate (H,1) matmuls).
    s1_ref[0] = jnp.sum(hf * a1_ref[...], axis=-1, keepdims=True)   # (TQ, 1)
    s2_ref[0] = jnp.sum(hf * a2_ref[...], axis=-1, keepdims=True)   # (TQ, 1)


# ---------------------------------------------------------------------------
# Kernel 2: softmax(dim=-1) -> attention @ h -> ELU   (row-tiled, fused)
# ---------------------------------------------------------------------------
def gat_softmax_matmul_kernel(att_ref, h_ref, out_ref):
    att = att_ref[0].astype(jnp.float32)                    # (TQ, N) f32 math
    m = jnp.max(att, axis=-1, keepdims=True)
    p = jnp.exp(att - m)
    denom = jnp.sum(p, axis=-1, keepdims=True)              # (TQ, 1)
    # bf16 MXU operands; normalize AFTER the matmul (H muls instead of N divs).
    out = jnp.dot(p.astype(jnp.bfloat16), h_ref[0],
                  preferred_element_type=jnp.float32)       # (TQ, H)
    out = out * pl.reciprocal(denom, approx=True)           # EUP vrcp slot
    # ELU(alpha=1): x if x > 0 else exp(x) - 1
    out = jnp.where(out > 0, out, jnp.exp(jnp.minimum(out, 0.0)) - 1.0)
    out_ref[0] = out.astype(out_ref.dtype)


# ---------------------------------------------------------------------------
# Glue: exact torch.Tensor.masked_scatter_ semantics without materializing e
# ---------------------------------------------------------------------------
def _masked_scatter_attention(adj, s1, s2, a_bias, n_node):
    """attention[b,i,j] = e.flatten()[k] if (adj>0)[b,i,j] else -9e15, where k
    is the rank of (b,i,j) among True positions (row-major) and
    e[b',i',j'] = LeakyReLU(s1[b',j'] + s2[b',i'] + a_bias)."""
    B = adj.shape[0]
    N = n_node
    mask = adj > 0
    incl = jnp.cumsum(mask.astype(jnp.int32), axis=-1)            # (B,N,N)
    rowcnt = incl[..., -1].reshape(-1)                            # (B*N,)
    rowoff = (jnp.cumsum(rowcnt) - rowcnt).reshape(B, N, 1)       # exclusive
    k = jnp.clip(rowoff + incl - 1, 0, B * N * N - 1)             # source index
    bp = k // (N * N)
    rem = k - bp * (N * N)
    ip = rem // N
    jp = rem - ip * N
    s1f = s1.reshape(-1)                                          # (B*N,)
    s2f = s2.reshape(-1)
    e_val = jnp.take(s1f, bp * N + jp) + jnp.take(s2f, bp * N + ip) + a_bias
    e_val = jnp.where(e_val > 0, e_val, _NEG_SLOPE * e_val)       # LeakyReLU
    return jnp.where(mask, e_val, _MASK_FILL).astype(jnp.bfloat16)


# ---------------------------------------------------------------------------
# Wrapper
# ---------------------------------------------------------------------------
def gat_conv_forward(x, adj, params, *, max_row_tile=1024):
    B, N, E = x.shape
    H = params["w_weight"].shape[0]
    f32, bf16 = jnp.float32, jnp.bfloat16

    vmem_limit = _vmem_limit_bytes()
    TQ = _pick_row_tile(N, H, int(vmem_limit * 0.85), max_row_tile)
    R = N // TQ

    x_bf = x.astype(bf16)                                   # bf16 MXU operand
    wt = params["w_weight"].T.astype(bf16)                  # (E, H)
    bw = params["w_bias"].astype(f32).reshape(1, H)
    aw = params["a_weight"].astype(f32).reshape(2 * H)
    a1 = aw[:H].reshape(1, H)                               # multiplies h_j
    a2 = aw[H:].reshape(1, H)                               # multiplies h_i
    ab = params["a_bias"].astype(f32)                       # (1,)

    cparams = pltpu.CompilerParams(
        dimension_semantics=("parallel", "parallel"),
        vmem_limit_bytes=vmem_limit)

    h, s1, s2 = pl.pallas_call(
        gat_proj_kernel,
        out_shape=(jax.ShapeDtypeStruct((B, N, H), bf16),
                   jax.ShapeDtypeStruct((B, N, 1), f32),
                   jax.ShapeDtypeStruct((B, N, 1), f32)),
        grid=(B, R),
        in_specs=[
            pl.BlockSpec((1, TQ, E), lambda b, r: (b, r, 0)),
            pl.BlockSpec((E, H), lambda b, r: (0, 0)),
            pl.BlockSpec((1, H), lambda b, r: (0, 0)),
            pl.BlockSpec((1, H), lambda b, r: (0, 0)),
            pl.BlockSpec((1, H), lambda b, r: (0, 0)),
        ],
        out_specs=(
            pl.BlockSpec((1, TQ, H), lambda b, r: (b, r, 0)),
            pl.BlockSpec((1, TQ, 1), lambda b, r: (b, r, 0)),
            pl.BlockSpec((1, TQ, 1), lambda b, r: (b, r, 0)),
        ),
        compiler_params=cparams,
    )(x_bf, wt, bw, a1, a2)

    # masked_scatter_ of e into a -9e15 tensor at adj > 0 (global, data-
    # dependent sequential fill -> plain-JAX glue, but e itself is recomputed
    # from (s1, s2) instead of being materialized in HBM).
    attention = _masked_scatter_attention(adj, s1[..., 0], s2[..., 0], ab, N)
    # Dropout: identity (eval mode).

    out = pl.pallas_call(
        gat_softmax_matmul_kernel,
        out_shape=jax.ShapeDtypeStruct((B, N, H), f32),
        grid=(B, R),
        in_specs=[
            pl.BlockSpec((1, TQ, N), lambda b, r: (b, r, 0)),
            pl.BlockSpec((1, N, H), lambda b, r: (b, 0, 0)),
        ],
        out_specs=pl.BlockSpec((1, TQ, H), lambda b, r: (b, r, 0)),
        compiler_params=cparams,
    )(attention, h)

    return out


# ---------------------------------------------------------------------------
# Deterministic parameter init (matches module __init__ shapes)
# ---------------------------------------------------------------------------
def _xavier_uniform(key, shape):
    fan_out, fan_in = shape
    bound = math.sqrt(6.0 / (fan_in + fan_out))
    return jax.random.uniform(key, shape, jnp.float32, -bound, bound)


def init_params(key, nemb, nhid):
    k1, k2, k3, k4 = jax.random.split(key, 4)
    w_weight = _xavier_uniform(k1, (nhid, nemb))              # nn.Linear(nemb, nhid)
    w_bias = jax.random.uniform(k2, (nhid,), jnp.float32,
                                -1.0 / math.sqrt(nemb), 1.0 / math.sqrt(nemb))
    a_weight = _xavier_uniform(k3, (1, 2 * nhid))             # nn.Linear(2*nhid, 1)
    a_bias = jax.random.uniform(k4, (1,), jnp.float32,
                                -1.0 / math.sqrt(2 * nhid), 1.0 / math.sqrt(2 * nhid))
    return {"w_weight": w_weight, "w_bias": w_bias,
            "a_weight": a_weight, "a_bias": a_bias}


if __name__ == "__main__":
    B, N, NEMB, NHID = 2, 8, 16, 32

    key = jax.random.PRNGKey(0)
    kx, kadj, kp = jax.random.split(key, 3)

    x = jax.random.normal(kx, (B, N, NEMB), dtype=jnp.float32)
    adj = jax.random.bernoulli(kadj, 0.5, (B, N, N)).astype(jnp.float32)
    params = init_params(kp, NEMB, NHID)

    fwd = jax.jit(gat_conv_forward)
    out = jax.block_until_ready(fwd(x, adj, params))

    assert out.shape == (B, N, NHID)
    assert bool(jnp.all(jnp.isfinite(out)))
    print("KERNEL_OK")
</pallas_src>

<mosaic_0001>
module attributes {stable_mosaic.version = 11 : i64} {
  func.func @gat_proj_kernel(%arg0: i32, %arg1: i32, %arg2: memref<1x8x16xbf16, #tpu.memory_space<vmem>>, %arg3: memref<16x32xbf16, #tpu.memory_space<vmem>>, %arg4: memref<1x32xf32, #tpu.memory_space<vmem>>, %arg5: memref<1x32xf32, #tpu.memory_space<vmem>>, %arg6: memref<1x32xf32, #tpu.memory_space<vmem>>, %arg7: memref<1x8x32xbf16, #tpu.memory_space<vmem>>, %arg8: memref<1x8x1xf32, #tpu.memory_space<vmem>>, %arg9: memref<1x8x1xf32, #tpu.memory_space<vmem>>) attributes {dimension_semantics = [#tpu.dimension_semantics<parallel>, #tpu.dimension_semantics<parallel>], iteration_bounds = array<i64: 2, 1>, scalar_prefetch = 0 : i64, scratch_operands = 0 : i64, tpu.core_type = #tpu.core_type<tc>, window_params = [{transform_indices = @transform_0, window_bounds = array<i64: 1, 8, 16>}, {pipeline_mode = #tpu.pipeline_mode<synchronous>, transform_indices = @transform_1, window_bounds = array<i64: 16, 32>}, {pipeline_mode = #tpu.pipeline_mode<synchronous>, transform_indices = @transform_2, window_bounds = array<i64: 1, 32>}, {pipeline_mode = #tpu.pipeline_mode<synchronous>, transform_indices = @transform_3, window_bounds = array<i64: 1, 32>}, {pipeline_mode = #tpu.pipeline_mode<synchronous>, transform_indices = @transform_4, window_bounds = array<i64: 1, 32>}, {transform_indices = @transform_5, window_bounds = array<i64: 1, 8, 32>}, {transform_indices = @transform_6, window_bounds = array<i64: 1, 8, 1>}, {transform_indices = @transform_7, window_bounds = array<i64: 1, 8, 1>}]} {
    %c0 = arith.constant 0 : index
    %c0_0 = arith.constant 0 : index
    %c0_1 = arith.constant 0 : index
    %0 = vector.load %arg2[%c0, %c0_0, %c0_1] : memref<1x8x16xbf16, #tpu.memory_space<vmem>>, vector<1x8x16xbf16>
    %1 = vector.shape_cast %0 : vector<1x8x16xbf16> to vector<8x16xbf16>
    %c0_2 = arith.constant 0 : index
    %c0_3 = arith.constant 0 : index
    %2 = vector.load %arg3[%c0_2, %c0_3] : memref<16x32xbf16, #tpu.memory_space<vmem>>, vector<16x32xbf16>
    %cst = arith.constant dense<0.000000e+00> : vector<8x32xf32>
    %3 = tpu.matmul %1, %2, %cst {dimension_numbers = #tpu.dot_dimension_numbers<[1], [0], [0], [1], [0, 0, 1, 1], [], []>} : vector<8x16xbf16>, vector<16x32xbf16>, vector<8x32xf32> -> vector<8x32xf32>
    %c0_4 = arith.constant 0 : index
    %c0_5 = arith.constant 0 : index
    %4 = vector.load %arg4[%c0_4, %c0_5] : memref<1x32xf32, #tpu.memory_space<vmem>>, vector<1x32xf32>
    %5 = vector.broadcast %4 : vector<1x32xf32> to vector<8x32xf32>
    %6 = arith.addf %3, %5 : vector<8x32xf32>
    %7 = arith.truncf %6 : vector<8x32xf32> to vector<8x32xbf16>
    %c0_6 = arith.constant 0 : index
    %c0_7 = arith.constant 0 : index
    %c0_8 = arith.constant 0 : index
    %8 = vector.load %arg7[%c0_6, %c0_7, %c0_8] : memref<1x8x32xbf16, #tpu.memory_space<vmem>>, vector<1x8x32xbf16>
    %9 = vector.shape_cast %8 : vector<1x8x32xbf16> to vector<8x32xbf16>
    %10 = vector.shape_cast %7 : vector<8x32xbf16> to vector<1x8x32xbf16>
    tpu.vector_store %arg7[%c0_6, %c0_7, %c0_8], %10 {strides = array<i32>} : memref<1x8x32xbf16, #tpu.memory_space<vmem>>, vector<1x8x32xbf16>,
    %c0_9 = arith.constant 0 : index
    %c0_10 = arith.constant 0 : index
    %11 = vector.load %arg5[%c0_9, %c0_10] : memref<1x32xf32, #tpu.memory_space<vmem>>, vector<1x32xf32>
    %12 = vector.broadcast %11 : vector<1x32xf32> to vector<8x32xf32>
    %13 = arith.mulf %6, %12 : vector<8x32xf32>
    %cst_11 = arith.constant dense<0.000000e+00> : vector<8xf32>
    %14 = vector.multi_reduction <add>, %13, %cst_11 [1] : vector<8x32xf32> to vector<8xf32>
    %15 = vector.shape_cast %14 : vector<8xf32> to vector<8x1xf32>
    %c0_12 = arith.constant 0 : index
    %c0_13 = arith.constant 0 : index
    %c0_14 = arith.constant 0 : index
    %16 = vector.load %arg8[%c0_12, %c0_13, %c0_14] : memref<1x8x1xf32, #tpu.memory_space<vmem>>, vector<1x8x1xf32>
    %17 = vector.shape_cast %16 : vector<1x8x1xf32> to vector<8x1xf32>
    %18 = vector.shape_cast %15 : vector<8x1xf32> to vector<1x8x1xf32>
    tpu.vector_store %arg8[%c0_12, %c0_13, %c0_14], %18 {strides = array<i32>} : memref<1x8x1xf32, #tpu.memory_space<vmem>>, vector<1x8x1xf32>,
    %c0_15 = arith.constant 0 : index
    %c0_16 = arith.constant 0 : index
    %19 = vector.load %arg6[%c0_15, %c0_16] : memref<1x32xf32, #tpu.memory_space<vmem>>, vector<1x32xf32>
    %20 = vector.broadcast %19 : vector<1x32xf32> to vector<8x32xf32>
    %21 = arith.mulf %6, %20 : vector<8x32xf32>
    %cst_17 = arith.constant dense<0.000000e+00> : vector<8xf32>
    %22 = vector.multi_reduction <add>, %21, %cst_17 [1] : vector<8x32xf32> to vector<8xf32>
    %23 = vector.shape_cast %22 : vector<8xf32> to vector<8x1xf32>
    %c0_18 = arith.constant 0 : index
    %c0_19 = arith.constant 0 : index
    %c0_20 = arith.constant 0 : index
    %24 = vector.load %arg9[%c0_18, %c0_19, %c0_20] : memref<1x8x1xf32, #tpu.memory_space<vmem>>, vector<1x8x1xf32>
    %25 = vector.shape_cast %24 : vector<1x8x1xf32> to vector<8x1xf32>
    %26 = vector.shape_cast %23 : vector<8x1xf32> to vector<1x8x1xf32>
    tpu.vector_store %arg9[%c0_18, %c0_19, %c0_20], %26 {strides = array<i32>} : memref<1x8x1xf32, #tpu.memory_space<vmem>>, vector<1x8x1xf32>,
    return
  }
  func.func @transform_0(%arg0: i32, %arg1: i32) -> (i32, i32, i32) {
    %c0_i32 = arith.constant 0 : i32
    %c0_i32_0 = arith.constant 0 : i32
    return %arg0, %arg1, %c0_i32 : i32, i32, i32
  }
  func.func @transform_1(%arg0: i32, %arg1: i32) -> (i32, i32) {
    %c0_i32 = arith.constant 0 : i32
    %c0_i32_0 = arith.constant 0 : i32
    %c0_i32_1 = arith.constant 0 : i32
    return %c0_i32, %c0_i32_0 : i32, i32
  }
  func.func @transform_2(%arg0: i32, %arg1: i32) -> (i32, i32) {
    %c0_i32 = arith.constant 0 : i32
    %c0_i32_0 = arith.constant 0 : i32
    %c0_i32_1 = arith.constant 0 : i32
    return %c0_i32, %c0_i32_0 : i32, i32
  }
  func.func @transform_3(%arg0: i32, %arg1: i32) -> (i32, i32) {
    %c0_i32 = arith.constant 0 : i32
    %c0_i32_0 = arith.constant 0 : i32
    %c0_i32_1 = arith.constant 0 : i32
    return %c0_i32, %c0_i32_0 : i32, i32
  }
  func.func @transform_4(%arg0: i32, %arg1: i32) -> (i32, i32) {
    %c0_i32 = arith.constant 0 : i32
    %c0_i32_0 = arith.constant 0 : i32
    %c0_i32_1 = arith.constant 0 : i32
    return %c0_i32, %c0_i32_0 : i32, i32
  }
  func.func @transform_5(%arg0: i32, %arg1: i32) -> (i32, i32, i32) {
    %c0_i32 = arith.constant 0 : i32
    %c0_i32_0 = arith.constant 0 : i32
    return %arg0, %arg1, %c0_i32 : i32, i32, i32
  }
  func.func @transform_6(%arg0: i32, %arg1: i32) -> (i32, i32, i32) {
    %c0_i32 = arith.constant 0 : i32
    %c0_i32_0 = arith.constant 0 : i32
    return %arg0, %arg1, %c0_i32 : i32, i32, i32
  }
  func.func @transform_7(%arg0: i32, %arg1: i32) -> (i32, i32, i32) {
    %c0_i32 = arith.constant 0 : i32
    %c0_i32_0 = arith.constant 0 : i32
    return %arg0, %arg1, %c0_i32 : i32, i32, i32
  }
}

module attributes {stable_mosaic.version = 11 : i64} {
  func.func @gat_softmax_matmul_kernel(%arg0: i32, %arg1: i32, %arg2: memref<1x8x8xbf16, #tpu.memory_space<vmem>>, %arg3: memref<1x8x32xbf16, #tpu.memory_space<vmem>>, %arg4: memref<1x8x32xf32, #tpu.memory_space<vmem>>) attributes {dimension_semantics = [#tpu.dimension_semantics<parallel>, #tpu.dimension_semantics<parallel>], iteration_bounds = array<i64: 2, 1>, scalar_prefetch = 0 : i64, scratch_operands = 0 : i64, tpu.core_type = #tpu.core_type<tc>, window_params = [{transform_indices = @transform_0, window_bounds = array<i64: 1, 8, 8>}, {transform_indices = @transform_1, window_bounds = array<i64: 1, 8, 32>}, {transform_indices = @transform_2, window_bounds = array<i64: 1, 8, 32>}]} {
    %c0 = arith.constant 0 : index
    %c0_0 = arith.constant 0 : index
    %c0_1 = arith.constant 0 : index
    %0 = vector.load %arg2[%c0, %c0_0, %c0_1] : memref<1x8x8xbf16, #tpu.memory_space<vmem>>, vector<1x8x8xbf16>
    %1 = vector.shape_cast %0 : vector<1x8x8xbf16> to vector<8x8xbf16>
    %2 = arith.extf %1 : vector<8x8xbf16> to vector<8x8xf32>
    %cst = arith.constant dense<0xFF800000> : vector<8xf32>
    %3 = vector.multi_reduction <maximumf>, %2, %cst [1] : vector<8x8xf32> to vector<8xf32>
    %4 = vector.shape_cast %3 : vector<8xf32> to vector<8x1xf32>
    %5 = vector.broadcast %4 : vector<8x1xf32> to vector<8x8xf32>
    %6 = arith.subf %2, %5 : vector<8x8xf32>
    %7 = math.exp %6 : vector<8x8xf32>
    %cst_2 = arith.constant dense<0.000000e+00> : vector<8xf32>
    %8 = vector.multi_reduction <add>, %7, %cst_2 [1] : vector<8x8xf32> to vector<8xf32>
    %9 = vector.shape_cast %8 : vector<8xf32> to vector<8x1xf32>
    %10 = arith.truncf %7 : vector<8x8xf32> to vector<8x8xbf16>
    %c0_3 = arith.constant 0 : index
    %c0_4 = arith.constant 0 : index
    %c0_5 = arith.constant 0 : index
    %11 = vector.load %arg3[%c0_3, %c0_4, %c0_5] : memref<1x8x32xbf16, #tpu.memory_space<vmem>>, vector<1x8x32xbf16>
    %12 = vector.shape_cast %11 : vector<1x8x32xbf16> to vector<8x32xbf16>
    %cst_6 = arith.constant dense<0.000000e+00> : vector<8x32xf32>
    %13 = tpu.matmul %10, %12, %cst_6 {dimension_numbers = #tpu.dot_dimension_numbers<[1], [0], [0], [1], [0, 0, 1, 1], [], []>} : vector<8x8xbf16>, vector<8x32xbf16>, vector<8x32xf32> -> vector<8x32xf32>
    %14 = tpu.reciprocal %9 {approx = true} : vector<8x1xf32> -> vector<8x1xf32>
    %15 = vector.broadcast %14 : vector<8x1xf32> to vector<8x32xf32>
    %16 = arith.mulf %13, %15 : vector<8x32xf32>
    %cst_7 = arith.constant 0.000000e+00 : f32
    %17 = vector.broadcast %cst_7 : f32 to vector<8x32xf32>
    %18 = arith.cmpf ogt, %16, %17 : vector<8x32xf32>
    %cst_8 = arith.constant 0.000000e+00 : f32
    %19 = vector.broadcast %cst_8 : f32 to vector<8x32xf32>
    %20 = arith.minimumf %16, %19 : vector<8x32xf32>
    %21 = math.exp %20 : vector<8x32xf32>
    %cst_9 = arith.constant 1.000000e+00 : f32
    %22 = vector.broadcast %cst_9 : f32 to vector<8x32xf32>
    %23 = arith.subf %21, %22 : vector<8x32xf32>
    %24 = arith.select %18, %16, %23 : vector<8x32xi1>, vector<8x32xf32>
    %c0_10 = arith.constant 0 : index
    %c0_11 = arith.constant 0 : index
    %c0_12 = arith.constant 0 : index
    %25 = vector.load %arg4[%c0_10, %c0_11, %c0_12] : memref<1x8x32xf32, #tpu.memory_space<vmem>>, vector<1x8x32xf32>
    %26 = vector.shape_cast %25 : vector<1x8x32xf32> to vector<8x32xf32>
    %27 = vector.shape_cast %24 : vector<8x32xf32> to vector<1x8x32xf32>
    tpu.vector_store %arg4[%c0_10, %c0_11, %c0_12], %27 {strides = array<i32>} : memref<1x8x32xf32, #tpu.memory_space<vmem>>, vector<1x8x32xf32>,
    return
  }
  func.func @transform_0(%arg0: i32, %arg1: i32) -> (i32, i32, i32) {
    %c0_i32 = arith.constant 0 : i32
    %c0_i32_0 = arith.constant 0 : i32
    return %arg0, %arg1, %c0_i32 : i32, i32, i32
  }
  func.func @transform_1(%arg0: i32, %arg1: i32) -> (i32, i32, i32) {
    %c0_i32 = arith.constant 0 : i32
    %c0_i32_0 = arith.constant 0 : i32
    %c0_i32_1 = arith.constant 0 : i32
    return %arg0, %c0_i32, %c0_i32_0 : i32, i32, i32
  }
  func.func @transform_2(%arg0: i32, %arg1: i32) -> (i32, i32, i32) {
    %c0_i32 = arith.constant 0 : i32
    %c0_i32_0 = arith.constant 0 : i32
    return %arg0, %arg1, %c0_i32 : i32, i32, i32
  }
}

</mosaic_0001>

<bundles_post_ra>
// kernel: squeeze.5
= control target key start
LH: loop header
LB: loop body
LE: loop exit
PB: predicated region body
PF: predicated region fallthrough
CT: control target
= control target key end

     0   :  { %vm7_vm0 = vcmask 64512   ;;  %vm13_vm1 = vcmask 130112   ;;  %s39_s0 = inlined_call_operand.vmem [shape: f32[2,8], index: 0, kind: input, shape index: {}]   ;;  %s40_s1 = inlined_call_operand.vmem [shape: f32[16], index: 1, kind: output, shape index: {}]  }
   0x1   :  { %v4_v0 = vld [vmem:[%s39_s0] sm:$0x3]  ;;  %s22_s0 = smov 8  }
   0x2   :  { %5 = vst [vmem:[#allocation1] sm:$0x3] %v4_v0 }
   0x9   :  { %v10_v1 = vld [vmem:[#allocation1 + $0x1] sm:$0x1]   ;;  %v6_v2 = vld [vmem:[#allocation1] sm:$0x1]  }
   0xa   :  { %11 = vrot.lane.b32.xlu0 %v10_v1, %s22_s0  ;;  %8 = vst.msk [vmem:[#allocation0] sm:$0x1] %vm7_vm0, %v6_v2  }
  0x7c   :  { %v12_v3 = vpop.permute.xlu0 %11  }
  0x7d   :  { %14 = vst.msk [vmem:[#allocation0] sm:$0x1] %vm13_vm1, %v12_v3  }
  0x84   :  { %v18_v4 = vld [vmem:[#allocation0] sm:$0x1] }
  0x85   :  { %20 = vst [vmem:[%s40_s1] sm:$0x1] %v18_v4 }

// kernel: gat_conv_forward.2
= control target key start
LH: loop header
LB: loop body
LE: loop exit
PB: predicated region body
PF: predicated region fallthrough
CT: control target
= control target key end

     0   :  { %s705_s24 = smov 0   ;;  %s707_s25 = smov 0   ;;  %s760_s0 = inlined_call_operand.vmem [shape: bf16[2,8,16], index: 0, kind: input, shape index: {}]   ;;  %s761_s1 = inlined_call_operand.vmem [shape: bf16[16,32], index: 1, kind: input, shape index: {}]   ;;  %s762_s2 = inlined_call_operand.vmem [shape: f32[1,32], index: 2, kind: input, shape index: {}]   ;;  %s763_s3 = inlined_call_operand.vmem [shape: f32[1,32], index: 3, kind: input, shape index: {}]   ;;  %s764_s4 = inlined_call_operand.vmem [shape: f32[1,32], index: 4, kind: input, shape index: {}]   ;;  %s765_s5 = inlined_call_operand.vmem [shape: bf16[2,8,32], index: 5, kind: output, shape index: {0}]   ;;  %s766_s6 = inlined_call_operand.vmem [shape: f32[2,8,1], index: 6, kind: output, shape index: {1}]   ;;  %s767_s7 = inlined_call_operand.vmem [shape: f32[2,8,1], index: 7, kind: output, shape index: {2}]  }
   0x1   :  { %s709_s26 = smov 0  }
   0x2 LB: > { %s30_s27 = sadd.s32 1, %s657_s25  ;;  %p592_p0 = scmp.ge.s32.totalorder %s661_s26, 1  ;;  %s661_s26 = sphi %s709_s26, %s18_s26   ;;  %s657_s25 = sphi %s707_s25, %s769_s25   ;;  %s653_s24 = sphi %s705_s24, %s768_s24  }
   0x3   : > { %p32_p1 = scmp.ge.s32.totalorder %s30_s27, 2  ;;  %p264_p2 = scmp.lt.s32.totalorder %s661_s26, 3 }
   0x5   : > { %s771_s27 = smov (%p32_p1, %s30_s27), 0  ;;  %p265_p3 = pnand %p592_p0, %p264_p2 }
   0x6   : > { %v638_v0 = vld [vmem:[%s761_s1] sm:$0xff] (!%p265_p3)   ;;  %v663_v1 = vmov (!%p265_p3), 0.0   ;;  %p314_p4 = scmp.lt.s32.totalorder (!%p265_p3), %s653_s24, 1  ;;  %vm664_vm0 = vmmov (!%p265_p3), 0   ;;  %vm359_vm1 = vcmask (!%p265_p3), 130048   ;;  %vm404_vm2 = vcmask (!%p265_p3), 257024  }
   0x7   : > { %268 = sbr.rel (%p265_p3) target bundleno = 382 (0x17e), region = 40  ;;  %606 = vmatprep.subr.bf16.mxu0 (!%p265_p3), %v663_v1  ;;  %608 = vmatprep.mubr.msk.bf16.mxu0 (!%p265_p3), %vm664_vm0, %v663_v1  ;;  %v597_v3 = vld [vmem:[%s762_s2] ss:$0 sm:$0xff] (!%p265_p3)  ;;  %vm414_vm3 = vcmask (!%p265_p3), 261120   ;;  %vm418_vm4 = vcmask (!%p265_p3), 7168  }
   0x8   : > { %607 = vmatpush3.bf16.msra.mxu0 (!%p265_p3), %v638_v0  ;;  %v600_v5 = vld [vmem:[%s763_s3] ss:$0 sm:$0xff] (!%p265_p3) }
   0x9   : > { %v601_v9 = vld [vmem:[%s764_s4] ss:$0 sm:$0xff] (!%p265_p3) }
   0xe   : > { %s773_s24 = smov (!%p314_p4, %s653_s24), 1 }
   0xf   : > { %s593_s30 = sshll.u32 %s773_s24, 2  ;;  %s595_s20 = sshll.u32 %s773_s24, 3 }
  0x10   : > { %s320_s10 = scalar_lea.vmem %s760_s0, %s593_s30  ;;  %s327_s17 = scalar_lea.vmem %s765_s5, %s593_s30 }
  0x11   : > { %v343_v2 = vld [vmem:[%s320_s10] sm:$0xf]  ;;  %s334_s23 = scalar_lea.vmem %s766_s6, %s595_s20  ;;  %s341_s30 = scalar_lea.vmem %s767_s7, %s595_s20 }
  0x12   : > { %609 = vmatmul.mubr.msk.bf16.vlgmr.msra.gmra.mrb[0].mxu0 %vm359_vm1, %v343_v2 }
  0xe5   : > { %v397_v4 = vpop.f32.mrb[0].mxu0 }
  0xe6   : > { %v398_v6 = vadd.f32 %v597_v3, %v397_v4  ;;  %v610_v7 = vpop.f32.mrb[1].mxu0 }
  0xe7   : > { %v400_v8 = vpop.f32.mrb[2].mxu0 }
  0xe8   : > { %v403_v10 = vpack.c.bf16 %v398_v6, %v398_v6  ;;  %v611_v11 = vpop.f32.mrb[3].mxu0  ;;  %v413_v12 = vmul.f32 %v600_v5, %v398_v6  ;;  %v427_v14 = vmul.f32 %v601_v9, %v398_v6 }
  0xea   : > { %405 = vst.msk [vmem:[%s327_s17] sm:$0xf] %vm404_vm2, %v403_v10  ;;  %v415_v13 = vsel %vm414_vm3, %v413_v12, 0.0  ;;  %v428_v15 = vsel %vm414_vm3, %v427_v14, 0.0 }
  0xeb   : > { %416 = vadd.xlane.f32.xlu0 %v415_v13 }
  0xef   : > { %429 = vadd.xlane.f32.xlu0 %v428_v15 }
 0x178   : > { %v417_v16 = vpop.xlane.xlu0 %416 }
 0x179   : > { %419 = vst.msk [vmem:[%s334_s23] sm:$0xff] %vm418_vm4, %v417_v16 }
 0x17c   : > { %v430_v17 = vpop.xlane.xlu0 %429 }
 0x17d   : > { %431 = vst.msk [vmem:[%s341_s30] sm:$0xff] %vm418_vm4, %v430_v17 }
 0x17e PF: > { %s18_s26 = sadd.s32 1, %s661_s26   ;;  %s768_s24 = smov %s657_s25 }
 0x17f   : > { %p15_p5 = scmp.ge.s32.totalorder %s18_s26, 4   ;;  %s769_s25 = smov %s771_s27 }
 0x181   :  { %17 = sbr.rel (!%p15_p5) target bundleno = 2 (0x2), region = 94 }

// kernel: gat_conv_forward.3
= control target key start
LH: loop header
LB: loop body
LE: loop exit
PB: predicated region body
PF: predicated region fallthrough
CT: control target
= control target key end

     0   :  { %7 = vsyncpa [#allocation3], 0  ;;  %s652_s0 = inlined_call_operand.vmem [shape: bf16[2,8,8], index: 0, kind: input, shape index: {}]   ;;  %s653_s1 = inlined_call_operand.vmem [shape: bf16[2,8,32], index: 1, kind: input, shape index: {}]   ;;  %s654_s2 = inlined_call_operand.hbm [shape: f32[2,8,32], index: 2, kind: output, shape index: {}]  }
   0x1   :  { %9 = vsyncpa [#allocation3 + $0x1], 0  ;;  %s534_s9 = smov 0   ;;  %s536_s10 = smov 0  }
   0x2   :  { %s538_s11 = smov 0   ;;  %s540_s12 = smov 0  }
   0x3   :  { %s542_s13 = smov 0   ;;  %s544_s14 = smov 0  }
   0x4 LB: > { %s351_s15 = sadd.s32 4294967295, %s514_s14   ;;  %s352_s16 = sadd.s32 4294967294, %s514_s14   ;;  %s514_s14 = sphi %s544_s14, %s15_s14   ;;  %s510_s13 = sphi %s542_s13, %s661_s13   ;;  %s506_s12 = sphi %s540_s12, %s660_s12   ;;  %s502_s11 = sphi %s538_s11, %s659_s11   ;;  %s498_s10 = sphi %s536_s10, %s658_s10   ;;  %s494_s9 = sphi %s534_s9, %s657_s9  }
   0x5   : > { %s27_s17 = sadd.s32 1, %s510_s13  ;;  %s90_s18 = sadd.s32 1, %s502_s11 }
   0x6   : > { %p29_p0 = scmp.ge.s32.totalorder %s27_s17, 2  ;;  %p100_p1 = scmp.ne.s32.totalorder %s502_s11, %s498_s10 }
   0x7   : > { %p101_p2 = scmp.eq.s32.totalorder %s351_s15, 1  ;;  %p106_p3 = scmp.ne.s32.totalorder %s498_s10, %s494_s9 }
   0x8   : > { %s663_s17 = smov (%p29_p0, %s27_s17), 0  ;;  %p107_p5 = scmp.eq.s32.totalorder %s352_s16, 1 }
   0x9   : > { %p574_p4 = por %p101_p2, %p100_p1  ;;  %s85_s20 = ssub.s32 %s510_s13, %s663_s17 }
   0xa   : > { %p355_p6 = scmp.ge.s32.totalorder %s514_s14, 1  ;;  %p88_p7 = scmp.eq.s32.totalorder %s85_s20, 0 }
   0xb   : > { %p581_p8 = por %p107_p5, %p106_p3  ;;  %p142_p9 = scmp.lt.s32.totalorder %s514_s14, 3 }
   0xc   : > { %s587_s22 = scalar_select %p88_p7, %s502_s11, %s90_s18  }
   0xd   : > { %p143_p10 = pnand %p355_p6, %p142_p9 }
   0xe   : > { %p170_p11 = scmp.lt.s32.totalorder (!%p143_p10), %s506_s12, 1  ;;  %vm184_vm0 = vcmask (!%p143_p10), 64512   ;;  %vm199_vm1 = vcmask (!%p143_p10), 1043456   ;;  %v516_v3 = vmov (!%p143_p10), 0.0   ;;  %vm517_vm2 = vmmov (!%p143_p10), 0   ;;  %s167_s3 = sand.u32 (!%p143_p10), 1, %s498_s10  }
   0xf   : > { %146 = sbr.rel (%p143_p10) target bundleno = 435 (0x1b3), region = 28  ;;  %367 = vmatprep.subr.bf16.mxu0 (!%p143_p10), %v516_v3  ;;  %369 = vmatprep.mubr.msk.bf16.mxu0 (!%p143_p10), %vm517_vm2, %v516_v3  ;;  %s356_s4 = sshll.u32 (!%p143_p10), %s167_s3, 3  ;;  %vm251_vm3 = vcmask (!%p143_p10), 261120  }
  0x10   : > { %s362_s5 = sshll.u32 (!%p143_p10), %s506_s12, 7  ;;  %s169_s6 = scalar_lea.vmem (!%p143_p10), [#allocation2], %s356_s4 }
  0x11   : > { %s268_s7 = sshll.u32 (!%p143_p10), %s169_s6, 4  ;;  %s605_s16 = scalar_lea.hbm (!%p143_p10), %s654_s2, %s362_s5  ;;  %s607_s7 = int_to_ptr.vmem [resolvable:$true] %s268_s7 }
  0x12   : > { %s254_s18 = scalar_lea.sflag (!%p143_p10), [#allocation3], %s167_s3  ;;  %s518_s20 = smov (!%p143_p10), [#allocation2]  }
  0x16   : > { %s171_s23 = scalar_select %p170_p11, %s506_s12, 1 }
  0x17   : > { %s436_s12 = scalar_lea.vmem %s607_s7, 128 }
  0x18   : > { %s357_s24 = sshll.u32 %s171_s23, 2  ;;  %p437_p12 = scmp.ne.s32.totalorder %s607_s7, %s436_s12 }
  0x19   : > { %s176_s27 = scalar_lea.vmem %s652_s0, %s357_s24  ;;  %s180_s30 = scalar_lea.vmem %s653_s1, %s357_s24 }
  0x1a   : > { %v182_v0 = vld [vmem:[%s176_s27] sm:$0xf]  ;;  %p438_p13 = pnand %p437_p12, %p574_p4  ;;  %s440_s23 = sshll.u32 %s518_s20, 4  ;;  %s441_s23 = int_to_ptr.vmem [resolvable:$false] %s440_s23 }
  0x1b   : > { %v183_v1 = vunpack.c.l.bf16 %v182_v0  ;;  %v195_v4 = vld [vmem:[%s180_s30] sm:$0xf]  ;;  %s442_s24 = scalar_lea.vmem %s441_s23, 256  ;;  %p443_p1 = scmp.lt.s32.totalorder %s607_s7, %s441_s23 }
  0x1c   : > { %v201_v5 = vsel %vm199_vm1, %v195_v4, 0  ;;  %p439_p0 = pneg %p438_p13  ;;  %p444_p2 = scmp.lt.s32.totalorder %s442_s24, %s436_s12 }
  0x1d   : > { %v185_v2 = vsel %vm184_vm0, %v183_v1, -inf  ;;  %368 = vmatpush3.bf16.msra.mxu0 %v201_v5 }
  0x1e   : > { %186 = vmax.xlane.f32.xlu0 %v185_v2  ;;  %p445_p3 = por %p444_p2, %p443_p1 }
  0x20   : > { %p446_p5 = pnand %p445_p3, %p439_p0 }
  0xab   : > { %v187_v6 = vpop.xlane.xlu0 %186 }
  0xac   : > { %v188_v7 = vsub.f32 %v183_v1, %v187_v6 }
  0xae   : > { %v189_v8 = vmul.f32 1.442695, %v188_v7 }
  0xb0   : > { %430 = vpow2.f32 %v189_v8 }
  0xba   : > { %v431_v9 = vpop.eup %430 }
  0xbb   : > { %v191_v10 = vsel %vm184_vm0, %v431_v9, 0.0  ;;  %v194_v11 = vpack.c.bf16 %v431_v9, %v431_v9 }
  0xbc   : > { %192 = vadd.xlane.f32.xlu0 %v191_v10 }
  0xbd   : > { %370 = vmatmul.mubr.msk.bf16.vlgmr.msra.gmra.mrb[0].mxu0 %vm184_vm0, %v194_v11 }
 0x149   : > { %v193_v12 = vpop.xlane.xlu0 %192 }
 0x14a   : > { %432 = vrcp.f32 %v193_v12 }
 0x154   : > { %v433_v13 = vpop.eup %432 }
 0x190   : > { %v237_v14 = vpop.f32.mrb[0].mxu0 }
 0x191   : > { %v244_v15 = vmul.f32 %v433_v13, %v237_v14  ;;  %v371_v16 = vpop.f32.mrb[1].mxu0 }
 0x192   : > { %v240_v17 = vpop.f32.mrb[2].mxu0 }
 0x193   : > { %v246_v18 = vmin.f32 %v244_v15, 0.0  ;;  %v372_v19 = vpop.f32.mrb[3].mxu0  ;;  %vm245_vm4 = vcmp.gt.f32.partialorder %v244_v15, 0.0 }
 0x195   : > { %v247_v20 = vmul.f32 1.442695, %v246_v18 }
 0x197   : > { %434 = vpow2.f32 %v247_v20 }
 0x1a1   : > { %v435_v21 = vpop.eup %434 }
 0x1a2   : > { %v360_v22 = vadd.f32 -1.0, %v435_v21 }
 0x1a4   : > { %v250_v23 = vsel %vm245_vm4, %v244_v15, %v360_v22 }
 0x1a5   : > { %252 = vst.msk [vmem:[%s169_s6] sm:$0xff] %vm251_vm3, %v250_v23 }
 0x1a6   : > { %449 = shalt.err (!%p446_p5)
}
 0x1a7   : > { %s450_s25 = scalar_lea.hbm %s605_s16, 128  ;;  %s454_s28 = scalar_lea.hbm %s654_s2, 256 }
 0x1a8   : > { %p451_p6 = scmp.ne.s32.totalorder %s605_s16, %s450_s25  ;;  %p455_p10 = scmp.lt.u32.totalorder %s605_s16, %s654_s2 }
 0x1a9   : > { %p456_p11 = scmp.lt.u32.totalorder %s454_s28, %s450_s25  ;;  %p458_p13 = scmp.lt.u32.totalorder %s450_s25, %s605_s16 }
 0x1aa   : > { %p452_p7 = pnand %p451_p6, %p574_p4 }
 0x1ab   : > { %p457_p12 = por %p456_p11, %p455_p10 }
 0x1ac   : > { %p453_p9 = pneg %p452_p7 }
 0x1ad   : > { %p459_p0 = por %p458_p13, %p457_p12 }
 0x1af   : > { %p460_p1 = pnand %p459_p0, %p453_p9 }
 0x1b1   : > { %463 = shalt.err (!%p460_p1)
}
 0x1b2   : > { %373 = dma.vmem_to_hbm [thread:$0]  (%p574_p4), %s607_s7, 128, %s605_s16, %s254_s18  }
 0x1b3 PF: > { %p379_p2 = scmp.ge.s32.totalorder %s514_s14, 2  ;;  %s280_s3 = sand.u32 1, %s494_s9  }
 0x1b4   : > { %s281_s4 = scalar_lea.sflag [#allocation3], %s280_s3 }
 0x1b5   : > { %p376_p3 = pnand %p379_p2, %p581_p8 }
 0x1b7   : > { %489 = dma.done.wait (!%p376_p3), %s281_s4, 128  }
 0x1b8   : > { %491 = vsyncadd (!%p376_p3), %s281_s4, 4294967168  ;;  %s15_s14 = sadd.s32 1, %s514_s14   ;;  %s657_s9 = smov %s498_s10 }
 0x1b9   : > { %p12_p5 = scmp.ge.s32.totalorder %s15_s14, 4   ;;  %s658_s10 = smov %s502_s11 }
 0x1ba   : > { %s659_s11 = smov %s587_s22  ;;  %s660_s12 = smov %s510_s13 }
 0x1bb   : > { %s661_s13 = smov %s663_s17  ;;  %14 = sbr.rel (!%p12_p5) target bundleno = 4 (0x4), region = 66 }
 0x1c2   :  { %286 = vsyncpa [#allocation3], 1 }
 0x1c3   :  { %288 = vsyncpa [#allocation3 + $0x1], 1 }

</bundles_post_ra>
